<compile_context>
chip_gen: v7x
topology: tpu7x:2x2x1
jax: 0.10.0
libtpu: 0.0.40
codegen_flags: <defaults>
</compile_context>

<pallas_src>
import math

import jax
import jax.numpy as jnp
from jax import lax
from jax.experimental import pallas as pl
from jax.experimental.pallas import tpu as pltpu


def _round_up(v, m):
    return (v + m - 1) // m * m


def _make_kernel(n, n_pad):
    """Build the kernel closure for an actual feature width n and lane-padded
    width n_pad (kernel refs are (tm, n_pad); HBM x/out arrays are (m, n))."""
    needs_lane_mask = n_pad != n

    def kernel(x_ref, w_ref, b_ref, o_ref):
        # x_ref : (tm, n_pad) block over an (m, n) array -> lanes >= n (and
        #         rows past m in the last tile) contain undefined data.
        # w_ref : (n_pad, n_pad) resident W^T (zero-padded), x dtype.
        # b_ref : (1, n_pad) resident f32 bias, -1e30 on padded columns.
        def load_x():
            xv = x_ref[...]
            if needs_lane_mask:
                lane = lax.broadcasted_iota(jnp.int32, xv.shape, 1)
                xv = jnp.where(lane < n, xv, jnp.zeros_like(xv))
            return xv

        # z[m, o] = sum_k x[m, k] * W^T[k, o] + b[o]  (plain (1,0) contraction,
        # W already transposed in the wrapper -> no in-kernel transpose).
        z = jnp.dot(load_x(), w_ref[...], preferred_element_type=jnp.float32)
        z = z + b_ref[...]
        # Numerically-stable softmax along the lane axis.  Padded columns get
        # -1e30 from the bias (and zero x / zero W rows), so exp() underflows
        # to 0 and the normalization over real columns is unchanged.
        z = z - jnp.max(z, axis=-1, keepdims=True)
        e = jnp.exp(z)
        att = e * pl.reciprocal(jnp.sum(e, axis=-1, keepdims=True), approx=True)
        # Element-wise gating; re-read x (don't keep it live across the MXU
        # region) and multiply in the input dtype.  Out-of-bounds rows/lanes
        # of the block are dropped by the masked boundary store.
        xv = load_x()
        o_ref[...] = (xv * att.astype(xv.dtype)).astype(o_ref.dtype)

    return kernel


def simple_attention(x, weight, bias, *, tm_max=2048):
    """Pallas implementation of SimpleAttention.forward.

    x      : (B, C, N) or (B, C, F, T)
    weight : (N, N)  -- nn.Linear weight (out_features, in_features), N == C
    bias   : (N,)    -- nn.Linear bias
    """
    if x.ndim not in (3, 4):
        raise ValueError(
            "The input tensor should be 3D or 4D in shape (B, C, N) or "
            f"(B, C, F, T). Got {x.ndim}D tensor."
        )
    orig_shape = x.shape
    b, c = x.shape[0], x.shape[1]
    n = math.prod(x.shape[2:])
    m = b * c
    if weight.shape != (n, n):
        raise ValueError(
            f"weight must be ({n}, {n}) to match the flattened feature axis; "
            f"got {weight.shape}"
        )

    x_dtype = x.dtype
    itemsize = jnp.dtype(x_dtype).itemsize
    n_pad = max(128, _round_up(n, 128))

    # --- resident operands: transpose once, cast to x dtype, pad once (tiny,
    # one-time HBM cost amortized over every row tile).
    w_t = weight.T.astype(x_dtype)                      # (in, out)
    b_f32 = bias.astype(jnp.float32).reshape(1, n)
    if n_pad != n:
        w_t = jnp.zeros((n_pad, n_pad), x_dtype).at[:n, :n].set(w_t)
        b_f32 = jnp.full((1, n_pad), -1e30, jnp.float32).at[:, :n].set(b_f32)

    w_bytes = n_pad * n_pad * itemsize                  # single-buffered resident
    b_bytes = 8 * n_pad * 4                             # sublane-padded f32 bias

    # --- dtype-aware row-tile budget, net of the resident weight/bias.
    total_target = 40 * 1024 * 1024                     # safe on v5e/v6e/v7x
    stream_budget = min(32 * 1024 * 1024,
                        max(4 * 1024 * 1024, total_target - w_bytes - b_bytes))
    # 2x double-buffered x tile + 2x double-buffered out tile + f32 temporaries.
    per_row = 4 * n_pad * itemsize + 4 * n_pad * 4
    tm_cap = max(8, min(tm_max, stream_budget // per_row))
    tm_cap -= tm_cap % 8
    tm_cap = min(tm_cap, _round_up(m, 8))

    # Tight-fitting tiles (minimal M-padding waste); >= 2 grid programs when
    # possible so v7x's second TensorCore gets work.
    num_tiles = pl.cdiv(m, tm_cap)
    if m >= 16:
        num_tiles = max(num_tiles, 2)
    tm = _round_up(pl.cdiv(m, num_tiles), 8)
    grid = (pl.cdiv(m, tm),)

    # Explicit VMEM limit from the actual allocations (with headroom), clamped
    # to a range that is valid on every generation.
    vmem_need = 4 * tm * n_pad * itemsize + 4 * tm * n_pad * 4 + w_bytes + b_bytes
    vmem_limit = int(1.25 * vmem_need) + (2 << 20)
    vmem_limit = max(16 * 1024 * 1024, min(vmem_limit, 64 * 1024 * 1024))

    x_flat = x.reshape(m, n)                            # view-style reshape, no pad

    out = pl.pallas_call(
        _make_kernel(n, n_pad),
        out_shape=jax.ShapeDtypeStruct((m, n), x_dtype),
        grid=grid,
        in_specs=[
            # streamed lane-dense x row tiles (boundary lanes/rows masked in-kernel)
            pl.BlockSpec((tm, n_pad), lambda i: (i, 0)),
            # fully-resident weight / bias: single VMEM copy, no double-buffering
            pl.BlockSpec(memory_space=pltpu.MemorySpace.VMEM),
            pl.BlockSpec(memory_space=pltpu.MemorySpace.VMEM),
        ],
        out_specs=pl.BlockSpec((tm, n_pad), lambda i: (i, 0)),
        compiler_params=pltpu.CompilerParams(
            dimension_semantics=("parallel",),
            vmem_limit_bytes=vmem_limit,
        ),
    )(x_flat, w_t, b_f32)

    return out.reshape(orig_shape)


def _reference(x, weight, bias):
    """Pure-JAX reference mirroring the PyTorch forward (f32 math)."""
    b, c = x.shape[0], x.shape[1]
    n = math.prod(x.shape[2:])
    z = x.reshape(b, c, n).astype(jnp.float32)
    z = jnp.einsum("bcn,on->bco", z, weight.astype(jnp.float32)) + bias.astype(jnp.float32)
    att = jax.nn.softmax(z, axis=-1)
    return x.astype(jnp.float32) * att.reshape(x.shape)


if __name__ == "__main__":
    key = jax.random.PRNGKey(0)
    k_x, k_w, k_b = jax.random.split(key, 3)

    # 4D input (B, C, F, T) with F*T == C so the Linear(C, C) applied to the
    # last (flattened) axis is well-formed, as the original module requires.
    B, C, F, T = 2, 16, 4, 4
    x = jax.random.normal(k_x, (B, C, F, T), dtype=jnp.float32)

    # Deterministic Linear(C, C) parameters (PyTorch-style uniform init bound).
    bound = 1.0 / math.sqrt(C)
    weight = jax.random.uniform(k_w, (C, C), jnp.float32, -bound, bound)
    bias = jax.random.uniform(k_b, (C,), jnp.float32, -bound, bound)

    # f32 path (exercises the ragged-N in-kernel masking: n=16 -> n_pad=128).
    out = jax.block_until_ready(simple_attention(x, weight, bias))
    ref = _reference(x, weight, bias)
    assert out.shape == x.shape
    # approx reciprocal on the EUP loosens the tolerance slightly vs. exact.
    assert jnp.allclose(out, ref, atol=2e-3, rtol=2e-3), "f32 mismatch vs reference"

    # bf16 path (native bf16 MXU matmul with a bf16-cast resident weight).
    x_bf16 = x.astype(jnp.bfloat16)
    out_bf16 = jax.block_until_ready(simple_attention(x_bf16, weight, bias))
    ref_bf16 = _reference(x_bf16, weight, bias)
    assert out_bf16.shape == x.shape
    assert jnp.allclose(out_bf16.astype(jnp.float32), ref_bf16,
                        atol=2e-2, rtol=5e-2), "bf16 mismatch vs reference"

    print("KERNEL_OK")
</pallas_src>

<mosaic_0001>
module attributes {stable_mosaic.version = 11 : i64} {
  func.func @kernel(%arg0: i32, %arg1: memref<16x128xf32, #tpu.memory_space<vmem>>, %arg2: memref<128x128xf32, #tpu.memory_space<vmem>>, %arg3: memref<1x128xf32, #tpu.memory_space<vmem>>, %arg4: memref<16x128xf32, #tpu.memory_space<vmem>>) attributes {dimension_semantics = [#tpu.dimension_semantics<parallel>], iteration_bounds = array<i64: 2>, scalar_prefetch = 0 : i64, scratch_operands = 0 : i64, tpu.core_type = #tpu.core_type<tc>, window_params = [{transform_indices = @transform_0, window_bounds = array<i64: 16, 128>}, {pipeline_mode = #tpu.pipeline_mode<synchronous>, transform_indices = @transform_1, window_bounds = array<i64: 128, 128>}, {pipeline_mode = #tpu.pipeline_mode<synchronous>, transform_indices = @transform_2, window_bounds = array<i64: 1, 128>}, {transform_indices = @transform_3, window_bounds = array<i64: 16, 128>}]} {
    %c0 = arith.constant 0 : index
    %c0_0 = arith.constant 0 : index
    %0 = vector.load %arg1[%c0, %c0_0] : memref<16x128xf32, #tpu.memory_space<vmem>>, vector<16x128xf32>
    %1 = tpu.iota {dimensions = array<i32: 1>} : vector<16x128xi32>
    %c16_i32 = arith.constant 16 : i32
    %2 = vector.broadcast %c16_i32 : i32 to vector<16x128xi32>
    %3 = arith.cmpi slt, %1, %2 : vector<16x128xi32>
    %cst = arith.constant 0.000000e+00 : f32
    %4 = vector.broadcast %cst : f32 to vector<16x128xf32>
    %5 = arith.select %3, %0, %4 : vector<16x128xi1>, vector<16x128xf32>
    %c0_1 = arith.constant 0 : index
    %c0_2 = arith.constant 0 : index
    %6 = vector.load %arg2[%c0_1, %c0_2] : memref<128x128xf32, #tpu.memory_space<vmem>>, vector<128x128xf32>
    %cst_3 = arith.constant dense<0.000000e+00> : vector<16x128xf32>
    %7 = tpu.matmul %5, %6, %cst_3 {dimension_numbers = #tpu.dot_dimension_numbers<[1], [0], [0], [1], [0, 0, 1, 1], [], []>} : vector<16x128xf32>, vector<128x128xf32>, vector<16x128xf32> -> vector<16x128xf32>
    %c0_4 = arith.constant 0 : index
    %c0_5 = arith.constant 0 : index
    %8 = vector.load %arg3[%c0_4, %c0_5] : memref<1x128xf32, #tpu.memory_space<vmem>>, vector<1x128xf32>
    %9 = vector.broadcast %8 : vector<1x128xf32> to vector<16x128xf32>
    %10 = arith.addf %7, %9 : vector<16x128xf32>
    %cst_6 = arith.constant dense<0xFF800000> : vector<16xf32>
    %11 = vector.multi_reduction <maximumf>, %10, %cst_6 [1] : vector<16x128xf32> to vector<16xf32>
    %12 = vector.shape_cast %11 : vector<16xf32> to vector<16x1xf32>
    %13 = vector.broadcast %12 : vector<16x1xf32> to vector<16x128xf32>
    %14 = arith.subf %10, %13 : vector<16x128xf32>
    %15 = math.exp %14 : vector<16x128xf32>
    %cst_7 = arith.constant dense<0.000000e+00> : vector<16xf32>
    %16 = vector.multi_reduction <add>, %15, %cst_7 [1] : vector<16x128xf32> to vector<16xf32>
    %17 = vector.shape_cast %16 : vector<16xf32> to vector<16x1xf32>
    %18 = tpu.reciprocal %17 {approx = true} : vector<16x1xf32> -> vector<16x1xf32>
    %19 = vector.broadcast %18 : vector<16x1xf32> to vector<16x128xf32>
    %20 = arith.mulf %15, %19 : vector<16x128xf32>
    %c0_8 = arith.constant 0 : index
    %c0_9 = arith.constant 0 : index
    %21 = vector.load %arg1[%c0_8, %c0_9] : memref<16x128xf32, #tpu.memory_space<vmem>>, vector<16x128xf32>
    %22 = tpu.iota {dimensions = array<i32: 1>} : vector<16x128xi32>
    %c16_i32_10 = arith.constant 16 : i32
    %23 = vector.broadcast %c16_i32_10 : i32 to vector<16x128xi32>
    %24 = arith.cmpi slt, %22, %23 : vector<16x128xi32>
    %cst_11 = arith.constant 0.000000e+00 : f32
    %25 = vector.broadcast %cst_11 : f32 to vector<16x128xf32>
    %26 = arith.select %24, %21, %25 : vector<16x128xi1>, vector<16x128xf32>
    %27 = arith.mulf %26, %20 : vector<16x128xf32>
    %c0_12 = arith.constant 0 : index
    %c0_13 = arith.constant 0 : index
    %28 = vector.load %arg4[%c0_12, %c0_13] : memref<16x128xf32, #tpu.memory_space<vmem>>, vector<16x128xf32>
    tpu.vector_store %arg4[%c0_12, %c0_13], %27 {strides = array<i32>} : memref<16x128xf32, #tpu.memory_space<vmem>>, vector<16x128xf32>,
    return
  }
  func.func @transform_0(%arg0: i32) -> (i32, i32) {
    %c0_i32 = arith.constant 0 : i32
    %c0_i32_0 = arith.constant 0 : i32
    return %arg0, %c0_i32 : i32, i32
  }
  func.func @transform_1(%arg0: i32) -> (i32, i32) {
    %c0_i32 = arith.constant 0 : i32
    %c0_i32_0 = arith.constant 0 : i32
    %c0_i32_1 = arith.constant 0 : i32
    return %c0_i32, %c0_i32_0 : i32, i32
  }
  func.func @transform_2(%arg0: i32) -> (i32, i32) {
    %c0_i32 = arith.constant 0 : i32
    %c0_i32_0 = arith.constant 0 : i32
    %c0_i32_1 = arith.constant 0 : i32
    return %c0_i32, %c0_i32_0 : i32, i32
  }
  func.func @transform_3(%arg0: i32) -> (i32, i32) {
    %c0_i32 = arith.constant 0 : i32
    %c0_i32_0 = arith.constant 0 : i32
    return %arg0, %c0_i32 : i32, i32
  }
}

</mosaic_0001>

<bundles_post_ra>
// kernel: tpu_custom_call.1
= control target key start
LH: loop header
LB: loop body
LE: loop exit
PB: predicated region body
PF: predicated region fallthrough
CT: control target
= control target key end

     0   :  { %8 = vsyncpa [#allocation3], 0  ;;  %s577_s12 = smov 0   ;;  %s650_s0 = inlined_call_operand.vmem [shape: f32[32,16], index: 0, kind: input, shape index: {}]   ;;  %s651_s1 = inlined_call_operand.hbm [shape: f32[128,128], index: 1, kind: input, shape index: {}]   ;;  %s652_s2 = inlined_call_operand.vmem [shape: f32[1,128], index: 2, kind: input, shape index: {}]   ;;  %s653_s3 = inlined_call_operand.vmem [shape: f32[32,16], index: 3, kind: output, shape index: {}]  }
   0x1 LB: > { %s384_s13 = sadd.s32 4294967295, %s552_s12   ;;  %p386_p0 = scmp.ge.s32.totalorder %s552_s12, 1  ;;  %s552_s12 = sphi %s577_s12, %s14_s12  }
   0x2   : > { %p113_p1 = scmp.lt.s32.totalorder %s552_s12, 3  ;;  %s554_s14 = smov [#allocation2]  }
   0x3   : > { %s125_s15 = sshll.u32 %s554_s14, 4  ;;  %p591_p3 = scmp.eq.s32.totalorder %s384_s13, 0  ;;  %s126_s15 = int_to_ptr.vmem [resolvable:$true] %s125_s15 }
   0x4   : > { %p585_p2 = pnand %p386_p0, %p113_p1  ;;  %s514_s21 = scalar_lea.hbm %s651_s1, 2048 }
   0x5   : > { %s658_s17 = scalar_select %p591_p3, 1, 0 }
   0x6   : > { %s657_s16 = scalar_select %p585_p2, 1, 0 }
   0x7   : > { %p489_p4 = pneg %p585_p2  ;;  %p515_p6 = scmp.ne.s32.totalorder %s651_s1, %s514_s21 }
   0x8   : > { %p521_p10 = scmp.lt.u32.totalorder %s514_s21, %s651_s1 }
   0x9   : > { %p599_p5 = pnand %p591_p3, %p489_p4 }
   0xb   : > { %p516_p7 = pneg %p599_p5 }
   0xd   : > { %p517_p8 = pnand %p516_p7, %p515_p6 }
   0xf   : > { %p518_p9 = pneg %p517_p8 }
  0x11   : > { %p523_p11 = pnand %p521_p10, %p518_p9 }
  0x13   : > { %526 = shalt.err (!%p523_p11)
}
  0x14   : > { %s527_s26 = scalar_lea.vmem %s126_s15, 2048  ;;  %p535_p1 = scmp.lt.s32.totalorder %s126_s15, %s126_s15 }
  0x15   : > { %p528_p12 = scmp.ne.s32.totalorder %s126_s15, %s527_s26  ;;  %p536_p4 = scmp.lt.s32.totalorder %s527_s26, %s527_s26 }
  0x17   : > { %p530_p13 = pnand %p528_p12, %p516_p7  ;;  %p537_p3 = por %p536_p4, %p535_p1 }
  0x19   : > { %p531_p0 = pneg %p530_p13 }
  0x1b   : > { %p538_p2 = pnand %p537_p3, %p531_p0 }
  0x1d   : > { %541 = shalt.err (!%p538_p2)
}
  0x1e   : > { %s555_s27 = smov 128   ;;  %s556_s28 = smov 8  }
  0x1f   : > { %492 = dma.hbm_to_vmem [thread:$0]  (!%p599_p5), %s651_s1, 2048, %s126_s15, [#allocation3], %s555_s27, %s555_s27, %s556_s28  }
  0x20   : > { %p660_p6 = scmp.ne.s32.totalorder %s657_s16, 0 }
  0x21   : > { %p661_p8 = scmp.ne.s32.totalorder (!%p660_p6), %s658_s17, 0 }
  0x22   : > { %153 = sbr.rel (%p660_p6) target bundleno = 611 (0x263), region = 32 }
  0x29   : > { %547 = dma.done.wait (%p661_p8), [#allocation3], 2048  }
  0x2a   : > { %549 = vsyncadd (%p661_p8), [#allocation3], 4294965248  ;;  %s391_s4 = sshll.u32 %s384_s13, 1  ;;  %v191_v0 = vlaneseq  ;;  %v196_v2 = vld [vmem:[#allocation2] sm:$0xff]  ;;  %v197_v3 = vld [vmem:[#allocation2 + $0x8] sm:$0xff] }
  0x2b   : > { %p178_p2 = scmp.lt.s32.totalorder %s391_s4, 3  ;;  %v198_v4 = vld [vmem:[#allocation2 + $0x10] sm:$0xff]  ;;  %v453_v5 = vpack.c.bf16 %v197_v3, %v196_v2  ;;  %v199_v6 = vld [vmem:[#allocation2 + $0x18] sm:$0xff]  ;;  %v200_v8 = vld [vmem:[#allocation2 + $0x20] sm:$0xff] }
  0x2c   : > { %v192_v1 = vand.u32 127, %v191_v0  ;;  %v457_v7 = vpack.c.bf16 %v199_v6, %v198_v4  ;;  %v201_v9 = vld [vmem:[#allocation2 + $0x28] sm:$0xff]  ;;  %v202_v13 = vld [vmem:[#allocation2 + $0x30] sm:$0xff]  ;;  %v203_v14 = vld [vmem:[#allocation2 + $0x38] sm:$0xff] }
  0x2d   : > { %s663_s4 = smov (!%p178_p2, %s391_s4), 3  ;;  %454 = vmatprep.subr.bf16.mxu0 %v453_v5  ;;  %v461_v10 = vpack.c.bf16 %v201_v9, %v200_v8  ;;  %v465_v17 = vpack.c.bf16 %v203_v14, %v202_v13  ;;  %v204_v18 = vld [vmem:[#allocation2 + $0x40] sm:$0xff]  ;;  %v205_v19 = vld [vmem:[#allocation2 + $0x48] sm:$0xff]  ;;  %v206_v21 = vld [vmem:[#allocation2 + $0x50] sm:$0xff] }
  0x2e   : > { %s392_s5 = sshll.u32 %s663_s4, 3  ;;  %vm193_vm0 = vcmp.lt.s32.totalorder %v192_v1, 16  ;;  %456 = vmatpush3.bf16.msra.mxu0 %v453_v5  ;;  %v469_v20 = vpack.c.bf16 %v205_v19, %v204_v18  ;;  %v207_v22 = vld [vmem:[#allocation2 + $0x58] sm:$0xff]  ;;  %v208_v24 = vld [vmem:[#allocation2 + $0x60] sm:$0xff]  ;;  %v209_v25 = vld [vmem:[#allocation2 + $0x68] sm:$0xff] }
  0x2f   : > { %s181_s8 = scalar_lea.vmem %s650_s0, %s392_s5  ;;  %458 = vmatprep.subr.bf16.mxu0 %v457_v7  ;;  %v473_v23 = vpack.c.bf16 %v207_v22, %v206_v21  ;;  %v477_v26 = vpack.c.bf16 %v209_v25, %v208_v24  ;;  %v210_v27 = vld [vmem:[#allocation2 + $0x70] sm:$0xff]  ;;  %v211_v28 = vld [vmem:[#allocation2 + $0x78] sm:$0xff]  ;;  %v395_v30 = vld [vmem:[%s652_s2] ss:$0 sm:$0xff]  ;;  %s187_s14 = scalar_lea.vmem %s653_s3, %s392_s5 }
  0x30   : > { %v189_v11 = vld [vmem:[%s181_s8] sm:$0xff]  ;;  %v190_v12 = vld [vmem:[%s181_s8 + $0x8] sm:$0xff]  ;;  %v481_v29 = vpack.c.bf16 %v211_v28, %v210_v27 }
  0x31   : > { %v194_v15 = vsel %vm193_vm0, %v189_v11, 0.0  ;;  %v195_v16 = vsel %vm193_vm0, %v190_v12, 0.0  ;;  %450 = vmatprep.mubr.msk.f32.mxu0 %vm193_vm0, %v189_v11 }
  0x32   : > { %460 = vmatpush3.bf16.msra.mxu0 %v457_v7 }
  0x33   : > { %462 = vmatprep.subr.bf16.mxu0 %v461_v10 }
  0x36   : > { %464 = vmatpush3.bf16.msra.mxu0 %v461_v10 }
  0x37   : > { %466 = vmatprep.subr.bf16.mxu0 %v465_v17 }
  0x3a   : > { %468 = vmatpush3.bf16.msra.mxu0 %v465_v17 }
  0x3b   : > { %470 = vmatprep.subr.bf16.mxu0 %v469_v20 }
  0x3e   : > { %472 = vmatpush3.bf16.msra.mxu0 %v469_v20 }
  0x3f   : > { %474 = vmatprep.subr.bf16.mxu0 %v473_v23 }
  0x42   : > { %476 = vmatpush3.bf16.msra.mxu0 %v473_v23 }
  0x43   : > { %478 = vmatprep.subr.bf16.mxu0 %v477_v26 }
  0x46   : > { %480 = vmatpush3.bf16.msra.mxu0 %v477_v26 }
  0x47   : > { %482 = vmatprep.subr.bf16.mxu0 %v481_v29 }
  0x4a   : > { %484 = vmatpush3.bf16.msra.mxu0 %v481_v29 }
  0x4d   : > { %451 = vmatmul.mubr.msk.f32.vlgmr.msra.gmra.mrb[0].mxu0 %vm193_vm0, %v190_v12 }
 0x120   : > { %v452_v31 = vpop.f32.mrb[0].mxu0 }
 0x121   : > { %v285_v32 = vpop.f32.mrb[1].mxu0  ;;  %v291_v34 = vadd.f32 %v452_v31, %v395_v30 }
 0x122   : > { %v286_v33 = vadd.f32 %v395_v30, %v285_v32 }
 0x124   : > { %294 = vmax.xlane.f32.xlu0 %v286_v33 }
 0x128   : > { %296 = vmax.xlane.f32.xlu0 %v291_v34 }
 0x1b1   : > { %v295_v35 = vpop.xlane.xlu0 %294 }
 0x1b2   : > { %v298_v36 = vsub.f32 %v286_v33, %v295_v35 }
 0x1b4   : > { %v300_v37 = vmul.f32 1.442695, %v298_v36 }
 0x1b5   : > { %v297_v38 = vpop.xlane.xlu0 %296 }
 0x1b6   : > { %506 = vpow2.f32 %v300_v37  ;;  %v299_v39 = vsub.f32 %v291_v34, %v297_v38 }
 0x1b8   : > { %v302_v40 = vmul.f32 1.442695, %v299_v39 }
 0x1ba   : > { %508 = vpow2.f32 %v302_v40 }
 0x1c0   : > { %v507_v41 = vpop.eup %506 }
 0x1c1   : > { %304 = vadd.xlane.f32.xlu1 %v507_v41 }
 0x1c4   : > { %v509_v42 = vpop.eup %508 }
 0x1c5   : > { %306 = vadd.xlane.f32.xlu1 %v509_v42 }
 0x24e   : > { %v305_v43 = vpop.xlane.xlu1 %304 }
 0x24f   : > { %510 = vrcp.f32 %v305_v43 }
 0x252   : > { %v307_v44 = vpop.xlane.xlu1 %306 }
 0x253   : > { %512 = vrcp.f32 %v307_v44 }
 0x259   : > { %v511_v45 = vpop.eup %510 }
 0x25a   : > { %v310_v46 = vmul.f32 %v511_v45, %v507_v41 }
 0x25c   : > { %v312_v47 = vmul.f32 %v310_v46, %v194_v15 }
 0x25d   : > { %v513_v48 = vpop.eup %512 }
 0x25e   : > { %314 = vst [vmem:[%s187_s14] sm:$0xff] %v312_v47  ;;  %v311_v49 = vmul.f32 %v513_v48, %v509_v42 }
 0x260   : > { %v313_v50 = vmul.f32 %v311_v49, %v195_v16 }
 0x262   : > { %315 = vst [vmem:[%s187_s14 + $0x8] sm:$0xff] %v313_v50 }
 0x263 PF: > { %s14_s12 = sadd.s32 1, %s552_s12  }
 0x264   : > { %p11_p3 = scmp.ge.s32.totalorder %s14_s12, 4  }
 0x266   :  { %13 = sbr.rel (!%p11_p3) target bundleno = 1 (0x1), region = 67 }
 0x26d   :  { %338 = vsyncpa [#allocation3], 1 }
 0x26e   :  { %340 = vsyncpa [#allocation3 + $0x1], 1 }

</bundles_post_ra>
